<compile_context>
chip_gen: v7x
topology: tpu7x:2x2x1
jax: 0.10.0
libtpu: 0.0.40
codegen_flags: <defaults>
</compile_context>

<pallas_src>
import jax
import jax.numpy as jnp
from jax.experimental import pallas as pl
from jax.experimental.pallas import tpu as pltpu


def _round_up(x, m):
    return (x + m - 1) // m * m


def _vmem_capacity_bytes():
    try:
        return int(pltpu.get_tpu_info().vmem_capacity_bytes)
    except Exception:
        return 64 * 1024 * 1024  # conservative fallback (v7x per-core VMEM)


# ---------------------------------------------------------------------------
# Fast path: the whole weight fits in VMEM -> single-K, no scratch at all.
# ---------------------------------------------------------------------------
def _skip_linear_fused_kernel(x_ref, w_ref, b_ref, o_ref):
    x = x_ref[...]
    acc = jnp.dot(x, w_ref[...], preferred_element_type=jnp.float32)     # MXU
    acc = acc + b_ref[...].astype(jnp.float32) + x.astype(jnp.float32)   # VPU
    o_ref[...] = acc.astype(o_ref.dtype)


# ---------------------------------------------------------------------------
# General path: K-only streaming of the weight; fp32 accumulator holds the
# full-width output row slab, residual + bias folded into it.
# ---------------------------------------------------------------------------
def _make_k_stream_kernel(tk, num_k):
    def kernel(x_ref, w_ref, b_ref, o_ref, acc_ref):
        k = pl.program_id(1)
        x = x_ref[...]
        p = jnp.dot(x, w_ref[...], preferred_element_type=jnp.float32)   # MXU

        @pl.when(k == 0)
        def _():
            # Bias folded into the first partial product (no separate init pass).
            acc_ref[...] = p + b_ref[...].astype(jnp.float32)

        @pl.when(k > 0)
        def _():
            acc_ref[...] += p

        # Residual: the k-th lhs block is exactly columns [k*tk, (k+1)*tk) of
        # this row slab, so x is streamed from HBM exactly once.  Unrolled
        # pl.when branches keep all accumulator slices static and aligned.
        for kk in range(num_k):
            @pl.when(k == kk)
            def _(kk=kk):
                acc_ref[:, kk * tk:(kk + 1) * tk] += x.astype(jnp.float32)

        @pl.when(k == num_k - 1)
        def _():
            o_ref[...] = acc_ref[...].astype(o_ref.dtype)

    return kernel


def _pick_tm(m, tm_max):
    tm = min(tm_max, _round_up(m, 8))
    # Prefer >= 4 row tiles (2 per TensorCore on v7x megacore, each pipelined)
    # whenever the row count allows it.
    while tm > 128 and pl.cdiv(m, tm) < 4:
        tm //= 2
    return max(tm, 8)


def skip_connection_linear(x, w, b, *, tm_max=512, force_k_split=False,
                           tk_override=None):
    """out = x + (x @ w + b).  x: (B, S, D), w: (D, D), b: (D,)."""
    B, S, D = x.shape
    M = B * S
    dtype = x.dtype

    # Lane-dense hidden dim; sublane-aligned row tiles.
    Dp = _round_up(D, 128)
    TM = _pick_tm(M, tm_max)

    x_itm = jnp.dtype(dtype).itemsize
    w_itm = jnp.dtype(w.dtype).itemsize
    o_itm = x_itm
    b_itm = jnp.dtype(b.dtype).itemsize

    vmem_cap = _vmem_capacity_bytes()
    budget = int(0.70 * vmem_cap)          # leave compiler headroom

    w_bytes = Dp * Dp * w_itm
    use_fast = (not force_k_split) and (w_bytes <= budget // 2)

    def fast_need(tm_):
        return (w_bytes                      # resident weight
                + 2 * tm_ * Dp * x_itm       # x blocks (double buffered)
                + 2 * tm_ * Dp * o_itm       # out blocks
                + 2 * 8 * Dp * b_itm)        # bias block (sublane padded)

    def kstream_need(tm_, tk_):
        return (2 * tm_ * tk_ * x_itm        # x blocks
                + 2 * tk_ * Dp * w_itm       # weight strips
                + 2 * tm_ * Dp * o_itm       # out blocks
                + tm_ * Dp * 4               # fp32 accumulator scratch
                + 2 * 8 * Dp * b_itm)        # bias block

    if use_fast:
        while fast_need(TM) > budget and TM > 8:
            TM = max(8, (TM // 2) // 8 * 8)
        TK = Dp
    else:
        # Largest 128-multiple reduction tile (prefer 256-multiples for the
        # 256x256 MXUs on v6e/v7x) that divides the padded hidden dim.
        if tk_override is not None:
            TK = tk_override
        else:
            TK = 512 if Dp % 512 == 0 else (256 if Dp % 256 == 0 else 128)
        while kstream_need(TM, TK) > budget and TK > 128 and Dp % (TK // 2) == 0:
            TK //= 2
        while kstream_need(TM, TK) > budget and TM > 8:
            TM = max(8, (TM // 2) // 8 * 8)
        # TODO(synk): for pathologically large D even TM=8/TK=128 may not fit
        # the full-width fp32 accumulator; an N-tiled fallback would be needed.

    Mp = _round_up(M, TM)
    grid_i = Mp // TM

    # Pad to (Mp, Dp).  Padded rows/cols are zero, contribute zero to the
    # matmul / bias / residual, and are sliced off below.
    x2 = x.reshape(M, D)
    if (Mp, Dp) != (M, D):
        x2 = jnp.zeros((Mp, Dp), dtype).at[:M, :D].set(x2)
    w2 = w if Dp == D else jnp.zeros((Dp, Dp), w.dtype).at[:D, :D].set(w)
    b2 = (b if Dp == D else jnp.zeros((Dp,), b.dtype).at[:D].set(b)).reshape(1, Dp)

    need = fast_need(TM) if use_fast else kstream_need(TM, TK)
    vmem_limit = int(min(vmem_cap - 2 * 1024 * 1024,
                         max(need + 4 * 1024 * 1024, 32 * 1024 * 1024)))

    if use_fast:
        cost = pl.CostEstimate(
            flops=2 * Mp * Dp * Dp,
            transcendentals=0,
            bytes_accessed=(Mp * Dp * x_itm         # x, read once
                            + Dp * Dp * w_itm       # weight, resident
                            + Dp * b_itm            # bias
                            + Mp * Dp * o_itm),     # out
        )
        out2 = pl.pallas_call(
            _skip_linear_fused_kernel,
            out_shape=jax.ShapeDtypeStruct((Mp, Dp), dtype),
            grid_spec=pltpu.PrefetchScalarGridSpec(
                num_scalar_prefetch=0,
                grid=(grid_i,),
                in_specs=[
                    pl.BlockSpec((TM, Dp), lambda i: (i, 0)),   # x
                    pl.BlockSpec((Dp, Dp), lambda i: (0, 0)),   # w (resident)
                    pl.BlockSpec((1, Dp), lambda i: (0, 0)),    # bias
                ],
                out_specs=pl.BlockSpec((TM, Dp), lambda i: (i, 0)),
            ),
            compiler_params=pltpu.CompilerParams(
                dimension_semantics=("parallel",),
                vmem_limit_bytes=vmem_limit,
            ),
            cost_estimate=cost,
        )(x2, w2, b2)
    else:
        grid_k = Dp // TK
        cost = pl.CostEstimate(
            flops=2 * Mp * Dp * Dp,
            transcendentals=0,
            bytes_accessed=(Mp * Dp * x_itm               # x, read once
                            + grid_i * Dp * Dp * w_itm    # weight per row tile
                            + Dp * b_itm
                            + Mp * Dp * o_itm),
        )
        out2 = pl.pallas_call(
            _make_k_stream_kernel(TK, grid_k),
            out_shape=jax.ShapeDtypeStruct((Mp, Dp), dtype),
            grid_spec=pltpu.PrefetchScalarGridSpec(
                num_scalar_prefetch=0,
                grid=(grid_i, grid_k),
                in_specs=[
                    pl.BlockSpec((TM, TK), lambda i, k: (i, k)),   # x (lhs)
                    pl.BlockSpec((TK, Dp), lambda i, k: (k, 0)),   # w strip
                    pl.BlockSpec((1, Dp), lambda i, k: (0, 0)),    # bias
                ],
                out_specs=pl.BlockSpec((TM, Dp), lambda i, k: (i, 0)),
                scratch_shapes=[pltpu.VMEM((TM, Dp), jnp.float32)],
            ),
            compiler_params=pltpu.CompilerParams(
                dimension_semantics=("parallel", "arbitrary"),
                vmem_limit_bytes=vmem_limit,
            ),
            cost_estimate=cost,
        )(x2, w2, b2)

    if (Mp, Dp) != (M, D):
        out2 = out2[:M, :D]
    return out2.reshape(B, S, D)


if __name__ == "__main__":
    key = jax.random.PRNGKey(0)
    kx, kw, kb, kx2, kw2, kb2 = jax.random.split(key, 6)

    # --- Fast path (the graph-encoder shape: embed_dim = 128, small batch) ---
    B, S, D = 4, 16, 128
    x = jax.random.normal(kx, (B, S, D), dtype=jnp.float32)
    # PyTorch nn.Linear stores weight as (out, in); pass its transpose so the
    # kernel computes x @ W^T + b.
    w_pt = jax.random.normal(kw, (D, D), dtype=jnp.float32) * (D ** -0.5)
    b = jax.random.normal(kb, (D,), dtype=jnp.float32) * 0.1
    w = w_pt.T

    out = skip_connection_linear(x, w, b)
    jax.block_until_ready(out)
    ref = x + (jnp.einsum("bsd,de->bse", x, w) + b)
    assert out.shape == (B, S, D)
    err = float(jnp.max(jnp.abs(out - ref)))
    assert jnp.allclose(out, ref, atol=1e-4, rtol=1e-4), err

    # --- General (K-streamed) path, forced, to validate the fallback --------
    B2, S2, D2 = 2, 8, 256
    x_b = jax.random.normal(kx2, (B2, S2, D2), dtype=jnp.float32)
    w_b = (jax.random.normal(kw2, (D2, D2), dtype=jnp.float32) * (D2 ** -0.5)).T
    b_b = jax.random.normal(kb2, (D2,), dtype=jnp.float32) * 0.1

    out_b = skip_connection_linear(x_b, w_b, b_b,
                                   force_k_split=True, tk_override=128)
    jax.block_until_ready(out_b)
    ref_b = x_b + (jnp.einsum("bsd,de->bse", x_b, w_b) + b_b)
    err_b = float(jnp.max(jnp.abs(out_b - ref_b)))
    assert jnp.allclose(out_b, ref_b, atol=1e-4, rtol=1e-4), err_b

    print("KERNEL_OK")
</pallas_src>

<mosaic_0001>
module attributes {stable_mosaic.version = 11 : i64} {
  func.func @_skip_linear_fused_kernel(%arg0: i32, %arg1: memref<64x128xf32, #tpu.memory_space<vmem>>, %arg2: memref<128x128xf32, #tpu.memory_space<vmem>>, %arg3: memref<1x128xf32, #tpu.memory_space<vmem>>, %arg4: memref<64x128xf32, #tpu.memory_space<vmem>>) attributes {dimension_semantics = [#tpu.dimension_semantics<parallel>], iteration_bounds = array<i64: 1>, scalar_prefetch = 0 : i64, scratch_operands = 0 : i64, tpu.core_type = #tpu.core_type<tc>, window_params = [{transform_indices = @transform_0, window_bounds = array<i64: 64, 128>}, {pipeline_mode = #tpu.pipeline_mode<synchronous>, transform_indices = @transform_1, window_bounds = array<i64: 128, 128>}, {pipeline_mode = #tpu.pipeline_mode<synchronous>, transform_indices = @transform_2, window_bounds = array<i64: 1, 128>}, {transform_indices = @transform_3, window_bounds = array<i64: 64, 128>}]} {
    %c0 = arith.constant 0 : index
    %c0_0 = arith.constant 0 : index
    %0 = vector.load %arg1[%c0, %c0_0] : memref<64x128xf32, #tpu.memory_space<vmem>>, vector<64x128xf32>
    %c0_1 = arith.constant 0 : index
    %c0_2 = arith.constant 0 : index
    %1 = vector.load %arg2[%c0_1, %c0_2] : memref<128x128xf32, #tpu.memory_space<vmem>>, vector<128x128xf32>
    %cst = arith.constant dense<0.000000e+00> : vector<64x128xf32>
    %2 = tpu.matmul %0, %1, %cst {dimension_numbers = #tpu.dot_dimension_numbers<[1], [0], [0], [1], [0, 0, 1, 1], [], []>} : vector<64x128xf32>, vector<128x128xf32>, vector<64x128xf32> -> vector<64x128xf32>
    %c0_3 = arith.constant 0 : index
    %c0_4 = arith.constant 0 : index
    %3 = vector.load %arg3[%c0_3, %c0_4] : memref<1x128xf32, #tpu.memory_space<vmem>>, vector<1x128xf32>
    %4 = vector.broadcast %3 : vector<1x128xf32> to vector<64x128xf32>
    %5 = arith.addf %2, %4 : vector<64x128xf32>
    %6 = arith.addf %5, %0 : vector<64x128xf32>
    %c0_5 = arith.constant 0 : index
    %c0_6 = arith.constant 0 : index
    %7 = vector.load %arg4[%c0_5, %c0_6] : memref<64x128xf32, #tpu.memory_space<vmem>>, vector<64x128xf32>
    tpu.vector_store %arg4[%c0_5, %c0_6], %6 {strides = array<i32>} : memref<64x128xf32, #tpu.memory_space<vmem>>, vector<64x128xf32>,
    return
  }
  func.func @transform_0(%arg0: i32) -> (i32, i32) {
    %c0_i32 = arith.constant 0 : i32
    %c0_i32_0 = arith.constant 0 : i32
    return %arg0, %c0_i32 : i32, i32
  }
  func.func @transform_1(%arg0: i32) -> (i32, i32) {
    %c0_i32 = arith.constant 0 : i32
    %c0_i32_0 = arith.constant 0 : i32
    %c0_i32_1 = arith.constant 0 : i32
    return %c0_i32, %c0_i32_0 : i32, i32
  }
  func.func @transform_2(%arg0: i32) -> (i32, i32) {
    %c0_i32 = arith.constant 0 : i32
    %c0_i32_0 = arith.constant 0 : i32
    %c0_i32_1 = arith.constant 0 : i32
    return %c0_i32, %c0_i32_0 : i32, i32
  }
  func.func @transform_3(%arg0: i32) -> (i32, i32) {
    %c0_i32 = arith.constant 0 : i32
    %c0_i32_0 = arith.constant 0 : i32
    return %arg0, %c0_i32 : i32, i32
  }
}

</mosaic_0001>

<bundles_post_ra>
// kernel: tpu_custom_call.1
= control target key start
LH: loop header
LB: loop body
LE: loop exit
PB: predicated region body
PF: predicated region fallthrough
CT: control target
= control target key end

     0   :  { %8 = vsyncpa [#allocation3], 0  ;;  %s488_s0 = inlined_call_operand.hbm [shape: f32[64,128], index: 0, kind: input, shape index: {}]   ;;  %s489_s1 = inlined_call_operand.hbm [shape: f32[128,128], index: 1, kind: input, shape index: {}]   ;;  %s490_s2 = inlined_call_operand.vmem [shape: f32[1,128], index: 2, kind: input, shape index: {}]   ;;  %s491_s3 = inlined_call_operand.hbm [shape: f32[64,128], index: 3, kind: output, shape index: {}]  }
   0x1   :  { %9 = vsyncpa [#allocation6], 0 }
   0x2   :  { %10 = vsyncpa [#allocation4], 0  ;;  %s407_s12 = smov [#allocation2]   ;;  %s335_s16 = scalar_lea.hbm %s488_s0, 1024 }
   0x3   :  { %s16_s13 = sshll.u32 %s407_s12, 4  ;;  %p336_p0 = scmp.ne.s32.totalorder %s488_s0, %s335_s16  ;;  %s17_s13 = int_to_ptr.vmem [resolvable:$true] %s16_s13 }
   0x4   :  { %p339_p1 = scmp.lt.u32.totalorder %s335_s16, %s488_s0 }
   0x6   :  { %p341_p2 = pnand %p339_p1, %p336_p0 }
   0x8   :  { %344 = shalt.err (!%p341_p2)
}
   0x9   :  { %s345_s21 = scalar_lea.vmem %s17_s13, 1024  ;;  %p350_p4 = scmp.lt.s32.totalorder %s17_s13, %s17_s13 }
   0xa   :  { %p346_p3 = scmp.ne.s32.totalorder %s17_s13, %s345_s21  ;;  %p351_p5 = scmp.lt.s32.totalorder %s345_s21, %s345_s21 }
   0xc   :  { %p352_p6 = por %p351_p5, %p350_p4 }
   0xe   :  { %p353_p7 = pnand %p352_p6, %p346_p3 }
  0x10   :  { %356 = shalt.err (!%p353_p7)
}
  0x11   :  { %s408_s22 = smov 128   ;;  %s409_s23 = smov 8  }
  0x12   :  { %22 = dma.hbm_to_vmem [thread:$0]  %s488_s0, 1024, %s17_s13, [#allocation3], %s408_s22, %s408_s22, %s409_s23  }
  0x13   :  { %s410_s26 = smov [#allocation5]   ;;  %s357_s30 = scalar_lea.hbm %s489_s1, 2048 }
  0x14   :  { %s28_s27 = sshll.u32 %s410_s26, 4  ;;  %p358_p8 = scmp.ne.s32.totalorder %s489_s1, %s357_s30  ;;  %s29_s27 = int_to_ptr.vmem [resolvable:$true] %s28_s27 }
  0x15   :  { %p361_p9 = scmp.lt.u32.totalorder %s357_s30, %s489_s1 }
  0x17   :  { %p363_p10 = pnand %p361_p9, %p358_p8 }
  0x19   :  { %366 = shalt.err (!%p363_p10)
}
  0x1a   :  { %s367_s8 = scalar_lea.vmem %s29_s27, 2048  ;;  %p372_p12 = scmp.lt.s32.totalorder %s29_s27, %s29_s27 }
  0x1b   :  { %p368_p11 = scmp.ne.s32.totalorder %s29_s27, %s367_s8  ;;  %p373_p13 = scmp.lt.s32.totalorder %s367_s8, %s367_s8 }
  0x1d   :  { %p374_p0 = por %p373_p13, %p372_p12 }
  0x1f   :  { %p375_p1 = pnand %p374_p0, %p368_p11 }
  0x21   :  { %378 = shalt.err (!%p375_p1)
}
  0x22   :  { %34 = dma.hbm_to_vmem [thread:$0]  %s489_s1, 2048, %s29_s27, [#allocation6], %s408_s22, %s408_s22, %s409_s23  }
  0x23   :  { %401 = dma.done.wait [#allocation3], 1024  }
  0x24   :  { %402 = vsyncadd [#allocation3], 4294966272 }
  0x25   :  { %403 = dma.done.wait [#allocation6], 2048  }
  0x26   :  { %404 = vsyncadd [#allocation6], 4294965248  ;;  %v51_v0 = vld [vmem:[#allocation5] sm:$0xff]  ;;  %v52_v1 = vld [vmem:[#allocation5 + $0x8] sm:$0xff] }
  0x27   :  { %v53_v2 = vld [vmem:[#allocation5 + $0x10] sm:$0xff]  ;;  %v282_v3 = vpack.c.bf16 %v52_v1, %v51_v0  ;;  %v54_v4 = vld [vmem:[#allocation5 + $0x18] sm:$0xff]  ;;  %v55_v6 = vld [vmem:[#allocation5 + $0x20] sm:$0xff] }
  0x28   :  { %v286_v5 = vpack.c.bf16 %v54_v4, %v53_v2  ;;  %v56_v7 = vld [vmem:[#allocation5 + $0x28] sm:$0xff]  ;;  %v462_v9 = vld [vmem:[#allocation2] sm:$0xff]  ;;  %v57_v11 = vld [vmem:[#allocation5 + $0x30] sm:$0xff] }
  0x29   :  { %283 = vmatprep.subr.bf16.mxu0 %v282_v3  ;;  %314 = vmatprep.subr.bf16.mxu1 %v282_v3  ;;  %v290_v8 = vpack.c.bf16 %v56_v7, %v55_v6  ;;  %v464_v10 = vld [vmem:[#allocation2 + $0x20] sm:$0xff]  ;;  %v58_v12 = vld [vmem:[#allocation5 + $0x38] sm:$0xff]  ;;  %v60_v15 = vld [vmem:[#allocation5 + $0x48] sm:$0xff] }
  0x2a   :  { %285 = vmatpush3.bf16.msra.mxu0 %v282_v3  ;;  %322 = vmatpush3.bf16.msra.mxu1 %v282_v3  ;;  %v294_v13 = vpack.c.bf16 %v58_v12, %v57_v11  ;;  %v59_v14 = vld [vmem:[#allocation5 + $0x40] sm:$0xff]  ;;  %v61_v17 = vld [vmem:[#allocation5 + $0x50] sm:$0xff]  ;;  %v62_v18 = vld [vmem:[#allocation5 + $0x58] sm:$0xff] }
  0x2b   :  { %287 = vmatprep.subr.bf16.mxu0 %v286_v5  ;;  %315 = vmatprep.subr.bf16.mxu1 %v286_v5  ;;  %v298_v16 = vpack.c.bf16 %v60_v15, %v59_v14  ;;  %v302_v19 = vpack.c.bf16 %v62_v18, %v61_v17  ;;  %v63_v20 = vld [vmem:[#allocation5 + $0x60] sm:$0xff]  ;;  %v64_v21 = vld [vmem:[#allocation5 + $0x68] sm:$0xff]  ;;  %v65_v23 = vld [vmem:[#allocation5 + $0x70] sm:$0xff] }
  0x2c   :  { %270 = vmatprep.mubr.f32.mxu0 %v462_v9  ;;  %276 = vmatprep.mubr.f32.mxu1 %v464_v10  ;;  %v306_v22 = vpack.c.bf16 %v64_v21, %v63_v20  ;;  %v66_v24 = vld [vmem:[#allocation5 + $0x78] sm:$0xff]  ;;  %v44_v26 = vld [vmem:[#allocation2 + $0x8] sm:$0xff]  ;;  %v45_v28 = vld [vmem:[#allocation2 + $0x10] sm:$0xff] }
  0x2d   :  { %v310_v25 = vpack.c.bf16 %v66_v24, %v65_v23  ;;  %v48_v27 = vld [vmem:[#allocation2 + $0x28] sm:$0xff]  ;;  %v49_v29 = vld [vmem:[#allocation2 + $0x30] sm:$0xff]  ;;  %v46_v30 = vld [vmem:[#allocation2 + $0x18] sm:$0xff] }
  0x2e   :  { %289 = vmatpush3.bf16.msra.mxu0 %v286_v5  ;;  %323 = vmatpush3.bf16.msra.mxu1 %v286_v5  ;;  %v50_v31 = vld [vmem:[#allocation2 + $0x38] sm:$0xff]  ;;  %v213_v32 = vld [vmem:[%s490_s2] ss:$0 sm:$0xff]  ;;  %s411_s2 = smov [#allocation7]  }
  0x2f   :  { %291 = vmatprep.subr.bf16.mxu0 %v290_v8  ;;  %316 = vmatprep.subr.bf16.mxu1 %v290_v8  ;;  %s200_s11 = sshll.u32 %s411_s2, 4  ;;  %s201_s11 = int_to_ptr.vmem [resolvable:$true] %s200_s11 }
  0x30   :  { %s379_s12 = scalar_lea.vmem %s201_s11, 1024  ;;  %p384_p3 = scmp.lt.s32.totalorder %s201_s11, %s201_s11 }
  0x31   :  { %p380_p2 = scmp.ne.s32.totalorder %s201_s11, %s379_s12  ;;  %p385_p4 = scmp.lt.s32.totalorder %s379_s12, %s379_s12 }
  0x32   :  { %293 = vmatpush3.bf16.msra.mxu0 %v290_v8  ;;  %324 = vmatpush3.bf16.msra.mxu1 %v290_v8 }
  0x33   :  { %295 = vmatprep.subr.bf16.mxu0 %v294_v13  ;;  %317 = vmatprep.subr.bf16.mxu1 %v294_v13  ;;  %p386_p5 = por %p385_p4, %p384_p3 }
  0x35   :  { %p387_p6 = pnand %p386_p5, %p380_p2 }
  0x36   :  { %297 = vmatpush3.bf16.msra.mxu0 %v294_v13  ;;  %325 = vmatpush3.bf16.msra.mxu1 %v294_v13 }
  0x37   :  { %299 = vmatprep.subr.bf16.mxu0 %v298_v16  ;;  %318 = vmatprep.subr.bf16.mxu1 %v298_v16 }
  0x3a   :  { %301 = vmatpush3.bf16.msra.mxu0 %v298_v16  ;;  %326 = vmatpush3.bf16.msra.mxu1 %v298_v16 }
  0x3b   :  { %303 = vmatprep.subr.bf16.mxu0 %v302_v19  ;;  %319 = vmatprep.subr.bf16.mxu1 %v302_v19 }
  0x3e   :  { %305 = vmatpush3.bf16.msra.mxu0 %v302_v19  ;;  %327 = vmatpush3.bf16.msra.mxu1 %v302_v19 }
  0x3f   :  { %307 = vmatprep.subr.bf16.mxu0 %v306_v22  ;;  %320 = vmatprep.subr.bf16.mxu1 %v306_v22 }
  0x42   :  { %309 = vmatpush3.bf16.msra.mxu0 %v306_v22  ;;  %328 = vmatpush3.bf16.msra.mxu1 %v306_v22 }
  0x43   :  { %311 = vmatprep.subr.bf16.mxu0 %v310_v25  ;;  %321 = vmatprep.subr.bf16.mxu1 %v310_v25 }
  0x46   :  { %313 = vmatpush3.bf16.msra.mxu0 %v310_v25  ;;  %329 = vmatpush3.bf16.msra.mxu1 %v310_v25 }
  0x49   :  { %271 = vmatmul.mubr.f32.vlgmr.msra.gmra.mrb[0].mxu0 %v44_v26  ;;  %277 = vmatmul.mubr.f32.vlgmr.msra.gmra.mrb[0].mxu1 %v48_v27 }
  0x4a   :  { %273 = vmatprep.mubr.f32.mxu0 %v45_v28  ;;  %279 = vmatprep.mubr.f32.mxu1 %v49_v29 }
  0x4d   :  { %274 = vmatmul.mubr.f32.gmra.mrb[2].mxu0 %v46_v30  ;;  %280 = vmatmul.mubr.f32.gmra.mrb[2].mxu1 %v50_v31 }
 0x11c   :  { %v272_v33 = vpop.f32.mrb[0].mxu0  ;;  %v278_v34 = vpop.f32.mrb[0].mxu1 }
 0x11d   :  { %v146_v35 = vadd.f32 %v272_v33, %v213_v32  ;;  %v166_v36 = vadd.f32 %v278_v34, %v213_v32  ;;  %v140_v37 = vpop.f32.mrb[1].mxu0  ;;  %v160_v38 = vpop.f32.mrb[1].mxu1 }
 0x11e   :  { %v141_v39 = vadd.f32 %v213_v32, %v140_v37  ;;  %v161_v40 = vadd.f32 %v213_v32, %v160_v38 }
 0x11f   :  { %v180_v41 = vadd.f32 %v146_v35, %v44_v26  ;;  %v184_v42 = vadd.f32 %v166_v36, %v48_v27 }
 0x120   :  { %v179_v43 = vadd.f32 %v141_v39, %v462_v9  ;;  %v183_v44 = vadd.f32 %v161_v40, %v464_v10  ;;  %v275_v45 = vpop.f32.mrb[2].mxu0  ;;  %v281_v46 = vpop.f32.mrb[2].mxu1 }
 0x121   :  { %188 = vst [vmem:[#allocation7 + $0x8] sm:$0xff] %v180_v41  ;;  %192 = vst [vmem:[#allocation7 + $0x28] sm:$0xff] %v184_v42  ;;  %v156_v47 = vadd.f32 %v275_v45, %v213_v32  ;;  %v176_v48 = vadd.f32 %v281_v46, %v213_v32  ;;  %v150_v49 = vpop.f32.mrb[3].mxu0  ;;  %v170_v50 = vpop.f32.mrb[3].mxu1 }
 0x122   :  { %187 = vst [vmem:[#allocation7] sm:$0xff] %v179_v43  ;;  %191 = vst [vmem:[#allocation7 + $0x20] sm:$0xff] %v183_v44  ;;  %v151_v51 = vadd.f32 %v213_v32, %v150_v49  ;;  %v171_v52 = vadd.f32 %v213_v32, %v170_v50 }
 0x123   :  { %v182_v53 = vadd.f32 %v156_v47, %v46_v30  ;;  %v186_v54 = vadd.f32 %v176_v48, %v50_v31 }
 0x124   :  { %v181_v55 = vadd.f32 %v151_v51, %v45_v28  ;;  %v185_v56 = vadd.f32 %v171_v52, %v49_v29 }
 0x125   :  { %190 = vst [vmem:[#allocation7 + $0x18] sm:$0xff] %v182_v53  ;;  %194 = vst [vmem:[#allocation7 + $0x38] sm:$0xff] %v186_v54 }
 0x126   :  { %189 = vst [vmem:[#allocation7 + $0x10] sm:$0xff] %v181_v55  ;;  %193 = vst [vmem:[#allocation7 + $0x30] sm:$0xff] %v185_v56 }
 0x127   :  { %390 = shalt.err (!%p387_p6)
}
 0x128   :  { %s391_s15 = scalar_lea.hbm %s491_s3, 1024 }
 0x129   :  { %p392_p7 = scmp.ne.s32.totalorder %s491_s3, %s391_s15  ;;  %p395_p8 = scmp.lt.u32.totalorder %s391_s15, %s491_s3 }
 0x12b   :  { %p397_p9 = pnand %p395_p8, %p392_p7 }
 0x12d   :  { %400 = shalt.err (!%p397_p9)
}
 0x12e   :  { %206 = dma.vmem_to_hbm [thread:$0]  %s201_s11, 1024, %s491_s3, [#allocation4], %s408_s22, %s408_s22, %s409_s23  }
 0x12f   :  { %405 = dma.done.wait [#allocation4], 1024  }
 0x130   :  { %406 = vsyncadd [#allocation4], 4294966272 }
 0x131   :  { %210 = vsyncpa [#allocation3], 1 }
 0x132   :  { %211 = vsyncpa [#allocation6], 1 }
 0x133   :  { %212 = vsyncpa [#allocation4], 1 }

</bundles_post_ra>
